<compile_context>
chip_gen: v5e
topology: v5e:2x2
jax: 0.10.0
libtpu: 0.0.40
codegen_flags: <defaults>
</compile_context>

<pallas_src>
import jax
import jax.numpy as jnp
from jax.experimental import pallas as pl
from jax.experimental.pallas import tpu as pltpu


def _round_up(n, m):
    return ((n + m - 1) // m) * m


def _choose_tile_b(batch, max_tile_b, min_grid_steps):
    """Pick the batch-tile size (second-minor block dim).

    * Tiny batches: one block covering the whole batch (block dim == full array
      dim is always a legal TPU block shape, no divisibility requirement).
    * Otherwise: 256-aligned tiles, capped by the VMEM budget (max_tile_b), and
      small enough that the grid has >= min_grid_steps steps so v7x's two
      TensorCores both get work.
    """
    if batch <= 1024:
        return batch
    tile = _round_up(pl.cdiv(batch, min_grid_steps), 256)
    return max(256, min(max_tile_b, tile))


def _landnet_kernel(x_ref,
                    w1_ref, b1_ref,
                    w2_ref, b2_ref,
                    w3_ref, b3_ref,
                    w4_ref, b4_ref,
                    o_ref):
    """Fused 4-layer MLP on one (tile_b, in_dims) batch tile.

    Activations are batch-major (rows = samples) and kept in f32 end-to-end;
    only x / the weights may be bf16 (the tensors that cross HBM).  All matmuls
    accumulate in f32 via preferred_element_type.
    """
    f32 = jnp.float32

    h = jnp.dot(x_ref[...], w1_ref[...], preferred_element_type=f32)
    h = jnp.maximum(h + b1_ref[...], 0.0)

    h = jnp.dot(h, w2_ref[...].astype(f32), preferred_element_type=f32)
    h = jnp.maximum(h + b2_ref[...], 0.0)

    h = jnp.dot(h, w3_ref[...].astype(f32), preferred_element_type=f32)
    h = jnp.maximum(h + b3_ref[...], 0.0)

    out = jnp.dot(h, w4_ref[...].astype(f32), preferred_element_type=f32) + b4_ref[...]
    o_ref[...] = out.astype(o_ref.dtype)


def landnet_forward(x, params, *, use_bf16=False, max_tile_b=8192, min_grid_steps=2):
    """LandNet forward pass.

    x: (B, in_dims) float32.
    params: dict with w1..w4 of shape (fan_in, fan_out) and b1..b4 of shape (fan_out,).
    use_bf16: store x and the weights as bf16 for the HBM->VMEM transfer and the
        first matmul (f32 accumulation, f32 activations).  Recommended for
        inference on v6e/v7x.
    """
    B, in_dims = x.shape
    hidden = params["w1"].shape[1]
    out_dims = params["w4"].shape[1]

    hbm_dtype = jnp.bfloat16 if use_bf16 else jnp.float32
    x_in = x.astype(hbm_dtype) if use_bf16 else x

    tile_b = _choose_tile_b(B, max_tile_b, min_grid_steps)
    grid = (pl.cdiv(B, tile_b),)

    # x / out: batch-tiled; weights/biases: constant index_map -> VMEM-resident.
    args = [x_in]
    in_specs = [pl.BlockSpec((tile_b, in_dims), lambda i: (i, 0))]
    for l in range(1, 5):
        w = params[f"w{l}"].astype(hbm_dtype)                   # (fan_in, fan_out)
        b = params[f"b{l}"].reshape(1, -1).astype(jnp.float32)  # (1, fan_out)
        args += [w, b]
        in_specs += [
            pl.BlockSpec(w.shape, lambda i: (0, 0)),
            pl.BlockSpec(b.shape, lambda i: (0, 0)),
        ]

    out_specs = pl.BlockSpec((tile_b, out_dims), lambda i: (i, 0))

    # Advisory cost estimate for XLA's scheduler (intrinsic traffic only).
    itemsize = jnp.dtype(hbm_dtype).itemsize
    flops = 2 * B * (in_dims * hidden + 2 * hidden * hidden + hidden * out_dims)
    w_bytes = sum(params[f"w{l}"].size * itemsize + params[f"b{l}"].size * 4
                  for l in range(1, 5))
    io_bytes = B * in_dims * itemsize + B * out_dims * 4
    cost = pl.CostEstimate(flops=flops, transcendentals=0,
                           bytes_accessed=io_bytes + w_bytes)

    return pl.pallas_call(
        _landnet_kernel,
        out_shape=jax.ShapeDtypeStruct((B, out_dims), jnp.float32),
        grid=grid,
        in_specs=in_specs,
        out_specs=out_specs,
        compiler_params=pltpu.CompilerParams(
            dimension_semantics=("parallel",),
            # Double-buffered (tile_b, <=32) blocks lane-pad to 128 in VMEM:
            # ~30-35 MiB worst case at tile_b=8192 f32.  64 MiB fits every
            # generation's physical VMEM (v7x: 64 MiB).
            vmem_limit_bytes=64 * 1024 * 1024,
        ),
        cost_estimate=cost,
    )(*args)


def init_params(key, in_dims, hidden, out_dims):
    """Deterministic init mimicking torch.nn.Linear's uniform(-1/sqrt(fan_in), 1/sqrt(fan_in))."""
    dims = [(in_dims, hidden), (hidden, hidden), (hidden, hidden), (hidden, out_dims)]
    params = {}
    for i, (fi, fo) in enumerate(dims, start=1):
        key, kw, kb = jax.random.split(key, 3)
        bound = 1.0 / jnp.sqrt(jnp.float32(fi))
        params[f"w{i}"] = jax.random.uniform(kw, (fi, fo), jnp.float32, -bound, bound)
        params[f"b{i}"] = jax.random.uniform(kb, (fo,), jnp.float32, -bound, bound)
    return params


def landnet_ref(x, params):
    h = x
    for i in range(1, 4):
        h = jnp.maximum(h @ params[f"w{i}"] + params[f"b{i}"], 0.0)
    return h @ params["w4"] + params["b4"]


if __name__ == "__main__":
    # Rocket-landing-style state vector: small in/out dims, modest hidden width.
    in_dims, hidden, out_dims = 6, 32, 3

    key = jax.random.PRNGKey(0)
    key, kx_small, kx_big = jax.random.split(key, 3)
    params = init_params(key, in_dims, hidden, out_dims)

    # 1) Tiny batch: single grid step, block dims == full array dims, exact f32.
    x_small = jax.random.normal(kx_small, (8, in_dims), dtype=jnp.float32)
    out_small = jax.block_until_ready(landnet_forward(x_small, params))
    ref_small = landnet_ref(x_small, params)
    assert out_small.shape == (8, out_dims)
    assert jnp.allclose(out_small, ref_small, atol=1e-5, rtol=1e-5)

    # 2) Non-tile-aligned batch: >=2 grid steps with a ragged last block
    #    (no wrapper padding, no wrapper transposes).
    x_big = jax.random.normal(kx_big, (2500, in_dims), dtype=jnp.float32)
    out_big = jax.block_until_ready(landnet_forward(x_big, params))
    ref_big = landnet_ref(x_big, params)
    assert out_big.shape == (2500, out_dims)
    assert jnp.allclose(out_big, ref_big, atol=1e-5, rtol=1e-5)

    # 3) bf16 HBM path: x + weights bf16, activations and accumulation f32.
    out_bf16 = jax.block_until_ready(landnet_forward(x_big, params, use_bf16=True))
    assert jnp.allclose(out_bf16, ref_big, atol=5e-2, rtol=5e-2)

    print("KERNEL_OK")
</pallas_src>

<mosaic_0001>
module attributes {stable_mosaic.version = 11 : i64} {
  func.func @_landnet_kernel(%arg0: i32, %arg1: memref<8x6xf32, #tpu.memory_space<vmem>>, %arg2: memref<6x32xf32, #tpu.memory_space<vmem>>, %arg3: memref<1x32xf32, #tpu.memory_space<vmem>>, %arg4: memref<32x32xf32, #tpu.memory_space<vmem>>, %arg5: memref<1x32xf32, #tpu.memory_space<vmem>>, %arg6: memref<32x32xf32, #tpu.memory_space<vmem>>, %arg7: memref<1x32xf32, #tpu.memory_space<vmem>>, %arg8: memref<32x3xf32, #tpu.memory_space<vmem>>, %arg9: memref<1x3xf32, #tpu.memory_space<vmem>>, %arg10: memref<8x3xf32, #tpu.memory_space<vmem>>) attributes {dimension_semantics = [#tpu.dimension_semantics<parallel>], iteration_bounds = array<i64: 1>, scalar_prefetch = 0 : i64, scratch_operands = 0 : i64, tpu.core_type = #tpu.core_type<tc>, window_params = [{transform_indices = @transform_0, window_bounds = array<i64: 8, 6>}, {pipeline_mode = #tpu.pipeline_mode<synchronous>, transform_indices = @transform_1, window_bounds = array<i64: 6, 32>}, {pipeline_mode = #tpu.pipeline_mode<synchronous>, transform_indices = @transform_2, window_bounds = array<i64: 1, 32>}, {pipeline_mode = #tpu.pipeline_mode<synchronous>, transform_indices = @transform_3, window_bounds = array<i64: 32, 32>}, {pipeline_mode = #tpu.pipeline_mode<synchronous>, transform_indices = @transform_4, window_bounds = array<i64: 1, 32>}, {pipeline_mode = #tpu.pipeline_mode<synchronous>, transform_indices = @transform_5, window_bounds = array<i64: 32, 32>}, {pipeline_mode = #tpu.pipeline_mode<synchronous>, transform_indices = @transform_6, window_bounds = array<i64: 1, 32>}, {pipeline_mode = #tpu.pipeline_mode<synchronous>, transform_indices = @transform_7, window_bounds = array<i64: 32, 3>}, {pipeline_mode = #tpu.pipeline_mode<synchronous>, transform_indices = @transform_8, window_bounds = array<i64: 1, 3>}, {transform_indices = @transform_9, window_bounds = array<i64: 8, 3>}]} {
    %c0 = arith.constant 0 : index
    %c0_0 = arith.constant 0 : index
    %0 = vector.load %arg1[%c0, %c0_0] : memref<8x6xf32, #tpu.memory_space<vmem>>, vector<8x6xf32>
    %c0_1 = arith.constant 0 : index
    %c0_2 = arith.constant 0 : index
    %1 = vector.load %arg2[%c0_1, %c0_2] : memref<6x32xf32, #tpu.memory_space<vmem>>, vector<6x32xf32>
    %cst = arith.constant dense<0.000000e+00> : vector<8x32xf32>
    %2 = tpu.matmul %0, %1, %cst {dimension_numbers = #tpu.dot_dimension_numbers<[1], [0], [0], [1], [0, 0, 1, 1], [], []>} : vector<8x6xf32>, vector<6x32xf32>, vector<8x32xf32> -> vector<8x32xf32>
    %c0_3 = arith.constant 0 : index
    %c0_4 = arith.constant 0 : index
    %3 = vector.load %arg3[%c0_3, %c0_4] : memref<1x32xf32, #tpu.memory_space<vmem>>, vector<1x32xf32>
    %4 = vector.broadcast %3 : vector<1x32xf32> to vector<8x32xf32>
    %5 = arith.addf %2, %4 : vector<8x32xf32>
    %cst_5 = arith.constant 0.000000e+00 : f32
    %6 = vector.broadcast %cst_5 : f32 to vector<8x32xf32>
    %7 = arith.maximumf %5, %6 : vector<8x32xf32>
    %c0_6 = arith.constant 0 : index
    %c0_7 = arith.constant 0 : index
    %8 = vector.load %arg4[%c0_6, %c0_7] : memref<32x32xf32, #tpu.memory_space<vmem>>, vector<32x32xf32>
    %cst_8 = arith.constant dense<0.000000e+00> : vector<8x32xf32>
    %9 = tpu.matmul %7, %8, %cst_8 {dimension_numbers = #tpu.dot_dimension_numbers<[1], [0], [0], [1], [0, 0, 1, 1], [], []>} : vector<8x32xf32>, vector<32x32xf32>, vector<8x32xf32> -> vector<8x32xf32>
    %c0_9 = arith.constant 0 : index
    %c0_10 = arith.constant 0 : index
    %10 = vector.load %arg5[%c0_9, %c0_10] : memref<1x32xf32, #tpu.memory_space<vmem>>, vector<1x32xf32>
    %11 = vector.broadcast %10 : vector<1x32xf32> to vector<8x32xf32>
    %12 = arith.addf %9, %11 : vector<8x32xf32>
    %cst_11 = arith.constant 0.000000e+00 : f32
    %13 = vector.broadcast %cst_11 : f32 to vector<8x32xf32>
    %14 = arith.maximumf %12, %13 : vector<8x32xf32>
    %c0_12 = arith.constant 0 : index
    %c0_13 = arith.constant 0 : index
    %15 = vector.load %arg6[%c0_12, %c0_13] : memref<32x32xf32, #tpu.memory_space<vmem>>, vector<32x32xf32>
    %cst_14 = arith.constant dense<0.000000e+00> : vector<8x32xf32>
    %16 = tpu.matmul %14, %15, %cst_14 {dimension_numbers = #tpu.dot_dimension_numbers<[1], [0], [0], [1], [0, 0, 1, 1], [], []>} : vector<8x32xf32>, vector<32x32xf32>, vector<8x32xf32> -> vector<8x32xf32>
    %c0_15 = arith.constant 0 : index
    %c0_16 = arith.constant 0 : index
    %17 = vector.load %arg7[%c0_15, %c0_16] : memref<1x32xf32, #tpu.memory_space<vmem>>, vector<1x32xf32>
    %18 = vector.broadcast %17 : vector<1x32xf32> to vector<8x32xf32>
    %19 = arith.addf %16, %18 : vector<8x32xf32>
    %cst_17 = arith.constant 0.000000e+00 : f32
    %20 = vector.broadcast %cst_17 : f32 to vector<8x32xf32>
    %21 = arith.maximumf %19, %20 : vector<8x32xf32>
    %c0_18 = arith.constant 0 : index
    %c0_19 = arith.constant 0 : index
    %22 = vector.load %arg8[%c0_18, %c0_19] : memref<32x3xf32, #tpu.memory_space<vmem>>, vector<32x3xf32>
    %cst_20 = arith.constant dense<0.000000e+00> : vector<8x3xf32>
    %23 = tpu.matmul %21, %22, %cst_20 {dimension_numbers = #tpu.dot_dimension_numbers<[1], [0], [0], [1], [0, 0, 1, 1], [], []>} : vector<8x32xf32>, vector<32x3xf32>, vector<8x3xf32> -> vector<8x3xf32>
    %c0_21 = arith.constant 0 : index
    %c0_22 = arith.constant 0 : index
    %24 = vector.load %arg9[%c0_21, %c0_22] : memref<1x3xf32, #tpu.memory_space<vmem>>, vector<1x3xf32>
    %25 = vector.broadcast %24 : vector<1x3xf32> to vector<8x3xf32>
    %26 = arith.addf %23, %25 : vector<8x3xf32>
    %c0_23 = arith.constant 0 : index
    %c0_24 = arith.constant 0 : index
    %27 = vector.load %arg10[%c0_23, %c0_24] : memref<8x3xf32, #tpu.memory_space<vmem>>, vector<8x3xf32>
    tpu.vector_store %arg10[%c0_23, %c0_24], %26 {strides = array<i32>} : memref<8x3xf32, #tpu.memory_space<vmem>>, vector<8x3xf32>,
    return
  }
  func.func @transform_0(%arg0: i32) -> (i32, i32) {
    %c0_i32 = arith.constant 0 : i32
    %c0_i32_0 = arith.constant 0 : i32
    return %arg0, %c0_i32 : i32, i32
  }
  func.func @transform_1(%arg0: i32) -> (i32, i32) {
    %c0_i32 = arith.constant 0 : i32
    %c0_i32_0 = arith.constant 0 : i32
    %c0_i32_1 = arith.constant 0 : i32
    return %c0_i32, %c0_i32_0 : i32, i32
  }
  func.func @transform_2(%arg0: i32) -> (i32, i32) {
    %c0_i32 = arith.constant 0 : i32
    %c0_i32_0 = arith.constant 0 : i32
    %c0_i32_1 = arith.constant 0 : i32
    return %c0_i32, %c0_i32_0 : i32, i32
  }
  func.func @transform_3(%arg0: i32) -> (i32, i32) {
    %c0_i32 = arith.constant 0 : i32
    %c0_i32_0 = arith.constant 0 : i32
    %c0_i32_1 = arith.constant 0 : i32
    return %c0_i32, %c0_i32_0 : i32, i32
  }
  func.func @transform_4(%arg0: i32) -> (i32, i32) {
    %c0_i32 = arith.constant 0 : i32
    %c0_i32_0 = arith.constant 0 : i32
    %c0_i32_1 = arith.constant 0 : i32
    return %c0_i32, %c0_i32_0 : i32, i32
  }
  func.func @transform_5(%arg0: i32) -> (i32, i32) {
    %c0_i32 = arith.constant 0 : i32
    %c0_i32_0 = arith.constant 0 : i32
    %c0_i32_1 = arith.constant 0 : i32
    return %c0_i32, %c0_i32_0 : i32, i32
  }
  func.func @transform_6(%arg0: i32) -> (i32, i32) {
    %c0_i32 = arith.constant 0 : i32
    %c0_i32_0 = arith.constant 0 : i32
    %c0_i32_1 = arith.constant 0 : i32
    return %c0_i32, %c0_i32_0 : i32, i32
  }
  func.func @transform_7(%arg0: i32) -> (i32, i32) {
    %c0_i32 = arith.constant 0 : i32
    %c0_i32_0 = arith.constant 0 : i32
    %c0_i32_1 = arith.constant 0 : i32
    return %c0_i32, %c0_i32_0 : i32, i32
  }
  func.func @transform_8(%arg0: i32) -> (i32, i32) {
    %c0_i32 = arith.constant 0 : i32
    %c0_i32_0 = arith.constant 0 : i32
    %c0_i32_1 = arith.constant 0 : i32
    return %c0_i32, %c0_i32_0 : i32, i32
  }
  func.func @transform_9(%arg0: i32) -> (i32, i32) {
    %c0_i32 = arith.constant 0 : i32
    %c0_i32_0 = arith.constant 0 : i32
    return %arg0, %c0_i32 : i32, i32
  }
}

</mosaic_0001>

<bundles_post_ra>
// kernel: tpu_custom_call.1
= control target key start
LH: loop header
LB: loop body
LE: loop exit
PB: predicated region body
PF: predicated region fallthrough
CT: control target
= control target key end

     0   :  { %14 = vsyncpa [#allocation3], 0  ;;  %s410_s0 = inlined_call_operand.hbm [shape: f32[8,6], index: 0, kind: input, shape index: {}]   ;;  %s411_s1 = inlined_call_operand.hbm [shape: f32[6,32], index: 1, kind: input, shape index: {}]   ;;  %s412_s2 = inlined_call_operand.vmem [shape: f32[1,32], index: 2, kind: input, shape index: {}]   ;;  %s413_s3 = inlined_call_operand.vmem [shape: f32[32,32], index: 3, kind: input, shape index: {}]   ;;  %s414_s4 = inlined_call_operand.vmem [shape: f32[1,32], index: 4, kind: input, shape index: {}]   ;;  %s415_s5 = inlined_call_operand.hbm [shape: f32[32,32], index: 5, kind: input, shape index: {}]   ;;  %s416_s6 = inlined_call_operand.vmem [shape: f32[1,32], index: 6, kind: input, shape index: {}]   ;;  %s417_s7 = inlined_call_operand.vmem [shape: f32[32,3], index: 7, kind: input, shape index: {}]   ;;  %s418_s8 = inlined_call_operand.vmem [shape: f32[1,3], index: 8, kind: input, shape index: {}]   ;;  %s419_s9 = inlined_call_operand.vmem [shape: f32[8,3], index: 9, kind: output, shape index: {}]  }
   0x1   :  { %15 = vsyncpa [#allocation5], 0  ;;  %s32_s11 = sshll.u32 %s411_s1, 4  ;;  %s304_s12 = smov [#allocation4]   ;;  %s33_s11 = int_to_ptr.hbm [resolvable:$true] %s32_s11 }
   0x2   :  { %s34_s13 = sshll.u32 %s304_s12, 4  ;;  %s21_s16 = sshll.u32 %s410_s0, 4  ;;  %s35_s13 = int_to_ptr.vmem [resolvable:$true] %s34_s13  ;;  %s22_s16 = int_to_ptr.hbm [resolvable:$true] %s21_s16 }
   0x3   :  { %37 = dma.hbm_to_vmem [thread:$0]  %s33_s11, 128, %s35_s13, [#allocation5]  }
   0x4   :  { %s305_s17 = smov [#allocation2]   ;;  %s48_s21 = sshll.u32 %s415_s5, 4  ;;  %s49_s21 = int_to_ptr.hbm [resolvable:$true] %s48_s21 }
   0x5   :  { %s23_s18 = sshll.u32 %s305_s17, 4  ;;  %s306_s1 = smov [#allocation6]   ;;  %s24_s18 = int_to_ptr.vmem [resolvable:$true] %s23_s18 }
   0x6   :  { %26 = dma.hbm_to_vmem [thread:$0]  %s22_s16, 128, %s24_s18, [#allocation3]  }
   0x7   :  { %s50_s22 = sshll.u32 %s306_s1, 4  ;;  %s307_s23 = smov 128   ;;  %s51_s22 = int_to_ptr.vmem [resolvable:$true] %s50_s22 }
   0x8   :  { %s308_s24 = smov 8  }
   0x9   :  { %56 = dma.hbm_to_vmem [thread:$0]  %s49_s21, 512, %s51_s22, [#allocation5], %s307_s23, %s307_s23, %s308_s24  }
   0xa   :  { %300 = dma.done.wait [#allocation3], 128  }
   0xb   :  { %301 = vsyncadd [#allocation3], 4294967168 }
   0xc   :  { %302 = dma.done.wait [#allocation5], 640  }
   0xd   :  { %303 = vsyncadd [#allocation5], 4294966656  ;;  %vm85_vm0 = vcmask 1045504   ;;  %vm81_vm1 = vcmask 48128   ;;  %v76_v0 = vld [vmem:[#allocation4] sm:$0x3f] }
   0xe   :  { %v75_v1 = vld [vmem:[#allocation2] sm:$0xff]  ;;  %v113_v2 = vld [vmem:[%s413_s3 + $0x18] sm:$0xff]  ;;  %214 = vmatpush.msk.msra.mxu0 %vm85_vm0, %v76_v0  ;;  %v112_v3 = vld [vmem:[%s413_s3 + $0x10] sm:$0xff]  ;;  %vm118_vm2 = vcmask 261120   ;;  %vm206_vm3 = vcmask 23552  }
   0xf   :  { %134 = vmatpush.msra.mxu1 %v113_v2  ;;  %215 = vmatmul.msk.f32.vlgmr.msra.gmra.mxu0 %vm81_vm1, %v75_v1  ;;  %v111_v4 = vld [vmem:[%s413_s3 + $0x8] sm:$0xff]  ;;  %v110_v5 = vld [vmem:[%s413_s3] sm:$0xff]  ;;  %v144_v12 = vld [vmem:[#allocation6 + $0x8] sm:$0xff] }
  0x10   :  { %v146_v6 = vld [vmem:[#allocation6 + $0x18] sm:$0xff]  ;;  %v224_v7 = vld [vmem:[%s412_s2] ss:$0 sm:$0xff]  ;;  %v143_v13 = vld [vmem:[#allocation6] sm:$0xff] }
  0x11   :  { %135 = vmatpush.msra.mxu1 %v112_v3  ;;  %166 = vmatpush.msra.mxu2 %v146_v6  ;;  %v145_v11 = vld [vmem:[#allocation6 + $0x10] sm:$0xff]  ;;  %v178_v14 = vld [vmem:[%s417_s7 + $0x18] sm:$0xff]  ;;  %v177_v19 = vld [vmem:[%s417_s7 + $0x10] sm:$0xff] }
  0x12   :  { %198 = vmatpush.msra.mxu3 %v178_v14  ;;  %v225_v15 = vld [vmem:[%s414_s4] ss:$0 sm:$0xff]  ;;  %v176_v20 = vld [vmem:[%s417_s7 + $0x8] sm:$0xff] }
  0x13   :  { %136 = vmatpush.msra.mxu1 %v111_v4  ;;  %167 = vmatpush.msra.mxu2 %v145_v11  ;;  %v175_v21 = vld [vmem:[%s417_s7] sm:$0xff] }
  0x14   :  { %199 = vmatpush.msra.mxu3 %v177_v19  ;;  %v226_v22 = vld [vmem:[%s416_s6] ss:$0 sm:$0xff] }
  0x15   :  { %137 = vmatpush.msra.mxu1 %v110_v5  ;;  %168 = vmatpush.msra.mxu2 %v144_v12  ;;  %v227_v26 = vld [vmem:[%s418_s8] ss:$0 sm:$0xff] }
  0x16   :  { %200 = vmatpush.msra.mxu3 %v176_v20 }
  0x17   :  { %169 = vmatpush.msra.mxu2 %v143_v13 }
  0x18   :  { %201 = vmatpush.msra.mxu3 %v175_v21 }
  0x8c   :  { %v106_v8 = vpop.f32.mrf.mxu0 }
  0x8d   :  { %v107_v9 = vadd.f32 %v224_v7, %v106_v8 }
  0x8f   :  { %v109_v10 = vmax.f32 %v107_v9, 0.0 }
  0x91   :  { %216 = vmatmul.msk.f32.vlgmr.msra.gmra.mxu1 %vm118_vm2, %v109_v10 }
 0x10e   :  { %v139_v16 = vpop.f32.mrf.mxu1 }
 0x10f   :  { %v140_v17 = vadd.f32 %v225_v15, %v139_v16 }
 0x111   :  { %v142_v18 = vmax.f32 %v140_v17, 0.0 }
 0x113   :  { %217 = vmatmul.msk.f32.vlgmr.msra.gmra.mxu2 %vm118_vm2, %v142_v18 }
 0x196   :  { %v171_v23 = vpop.f32.mrf.mxu2 }
 0x197   :  { %v172_v24 = vadd.f32 %v226_v22, %v171_v23 }
 0x199   :  { %v174_v25 = vmax.f32 %v172_v24, 0.0 }
 0x19b   :  { %218 = vmatmul.msk.f32.vlgmr.msra.gmra.mxu3 %vm118_vm2, %v174_v25 }
 0x21e   :  { %v203_v27 = vpop.f32.mrf.mxu3 }
 0x21f   :  { %v204_v28 = vadd.f32 %v227_v26, %v203_v27 }
 0x221   :  { %207 = vst.msk [vmem:[%s419_s9] sm:$0xff] %vm206_vm3, %v204_v28 }
 0x222   :  { %212 = vsyncpa [#allocation3], 1 }
 0x223   :  { %213 = vsyncpa [#allocation5], 1 }

</bundles_post_ra>
